<compile_context>
chip_gen: v6e
topology: v6e:2x2x1
jax: 0.10.0
libtpu: 0.0.40
codegen_flags: <defaults>
</compile_context>

<pallas_src>
import jax
import jax.numpy as jnp
import numpy as np
from jax.experimental import pallas as pl
from jax.experimental.pallas import tpu as pltpu

_MAX_LANE_W = 1024      # lane-dense last dim: large multiple of 128 (unmasked full-width stores)
_MAX_BLOCK_ROWS = 512   # rows per grid step for large tensors: 512x1024 f32 = 2 MiB block;
                        # in+out double-buffered ~8 MiB, inside v5e's 16 MiB scoped-VMEM default.


def _identity_kernel(x_ref, o_ref):
    # Pure pass-through: load the VMEM tile and store it back.
    o_ref[...] = x_ref[...]


def _copy_lane_dense(x2: jax.Array) -> jax.Array:
    """Identity copy of a lane-dense 2D slab (last dim a multiple of 128)."""
    rows, lane_w = x2.shape
    if rows <= _MAX_BLOCK_ROWS:
        # Single block, no grid: one pipeline step, no per-step (~0.35 us) overhead.
        return pl.pallas_call(
            _identity_kernel,
            out_shape=jax.ShapeDtypeStruct((rows, lane_w), x2.dtype),
            input_output_aliases={0: 0},   # alias/donate input; no extra HBM allocation
        )(x2)
    # Large tensors: 1D grid over rows with big lane-dense tiles (~85% of copy roofline).
    grid = (pl.cdiv(rows, _MAX_BLOCK_ROWS),)
    return pl.pallas_call(
        _identity_kernel,
        out_shape=jax.ShapeDtypeStruct((rows, lane_w), x2.dtype),
        grid_spec=pltpu.PrefetchScalarGridSpec(
            num_scalar_prefetch=0,
            grid=grid,
            in_specs=[pl.BlockSpec((_MAX_BLOCK_ROWS, lane_w), lambda i: (i, 0))],
            out_specs=pl.BlockSpec((_MAX_BLOCK_ROWS, lane_w), lambda i: (i, 0)),
        ),
        input_output_aliases={0: 0},
        compiler_params=pltpu.CompilerParams(
            # One parallel axis lets v7x's two TensorCores split the copy;
            # near-zero effect on single-TC v5e/v6e (harmless).
            dimension_semantics=("parallel",),
        ),
    )(x2)


def print_layer(x: jax.Array, *, verbose: bool = True) -> jax.Array:
    """Pallas implementation of PrintLayer.forward: print(x) and return x unchanged."""
    if verbose:
        # Module side effect: the PyTorch module prints the *input* tensor.
        # Host-side print (forces a D2H sync), so it is gated behind a flag.
        # TODO(synk): use jax.debug.print / io_callback if the print must survive jit;
        # in-kernel printing is scalar-only (pl.debug_print).
        print(f"after relu: {x}")

    total = x.size
    lane_w = 0
    for cand in (_MAX_LANE_W, 512, 256, 128):
        if total % cand == 0:
            lane_w = cand
            break

    if lane_w == 0:
        # Rare fallback: total not a multiple of 128.  Whole-array single block
        # (block == full array dims, so no (8,128) tiling constraint applies).
        return pl.pallas_call(
            _identity_kernel,
            out_shape=jax.ShapeDtypeStruct(x.shape, x.dtype),
            input_output_aliases={0: 0},
        )(x)

    # Lane-dense view: last dim is a large multiple of 128.
    x2 = x.reshape(total // lane_w, lane_w)
    out2 = _copy_lane_dense(x2)
    return out2.reshape(x.shape)


if __name__ == "__main__":
    key = jax.random.PRNGKey(0)
    # Small NCHW input consistent with a conv-autoencoder feature map.
    x = jax.random.normal(key, (2, 4, 16, 16), dtype=jnp.float32)
    x_host = np.asarray(jax.device_get(x))   # reference copy (robust to buffer donation)

    y = print_layer(x)          # default verbose=True matches the PyTorch module
    y = jax.block_until_ready(y)

    # Sanity check: output must be bit-identical to the input.
    assert y.shape == x.shape and y.dtype == x.dtype
    assert np.array_equal(np.asarray(jax.device_get(y)), x_host)
    print("KERNEL_OK")
</pallas_src>

<mosaic_0001>
module attributes {stable_mosaic.version = 11 : i64} {
  func.func @_identity_kernel(%arg0: memref<2x1024xf32, #tpu.memory_space<vmem>>, %arg1: memref<2x1024xf32, #tpu.memory_space<vmem>>) attributes {dimension_semantics = [], scalar_prefetch = 0 : i64, scratch_operands = 0 : i64, tpu.core_type = #tpu.core_type<tc>} {
    %c0 = arith.constant 0 : index
    %c0_0 = arith.constant 0 : index
    %0 = vector.load %arg0[%c0, %c0_0] : memref<2x1024xf32, #tpu.memory_space<vmem>>, vector<2x1024xf32>
    %c0_1 = arith.constant 0 : index
    %c0_2 = arith.constant 0 : index
    %1 = vector.load %arg1[%c0_1, %c0_2] : memref<2x1024xf32, #tpu.memory_space<vmem>>, vector<2x1024xf32>
    tpu.vector_store %arg1[%c0_1, %c0_2], %0 {strides = array<i32>} : memref<2x1024xf32, #tpu.memory_space<vmem>>, vector<2x1024xf32>,
    return
  }
}

</mosaic_0001>

<bundles_post_ra>
// kernel: tpu_custom_call.1
= control target key start
LH: loop header
LB: loop body
LE: loop exit
PB: predicated region body
PF: predicated region fallthrough
CT: control target
= control target key end

     0   :  { %6 = vsyncpa [#allocation3], 0  ;;  %s104_s0 = inlined_call_operand.hbm [shape: f32[2,1024], index: 0, kind: input, shape index: {}, may-alias: {0,1}]   ;;  %s105_s1 = inlined_call_operand.hbm [shape: f32[2,1024], index: 1, kind: output, shape index: {}, may-alias: {0,1}]  }
   0x1   :  { %7 = vsyncpa [#allocation4], 0  ;;  %s86_s6 = smov [#allocation2]  }
   0x2   :  { %s14_s7 = sshll.u32 %s86_s6, 4  ;;  %s15_s7 = int_to_ptr.vmem [resolvable:$true] %s14_s7 }
   0x3   :  { %s50_s8 = scalar_lea.vmem %s15_s7, 256  ;;  %p55_p1 = scmp.lt.s32.totalorder %s15_s7, %s15_s7 }
   0x4   :  { %p51_p0 = scmp.ne.s32.totalorder %s15_s7, %s50_s8  ;;  %p56_p2 = scmp.lt.s32.totalorder %s50_s8, %s50_s8 }
   0x6   :  { %p57_p3 = por %p56_p2, %p55_p1 }
   0x8   :  { %p58_p4 = pnand %p57_p3, %p51_p0 }
   0xa   :  { %61 = shalt.err (!%p58_p4)
}
   0xb   :  { %17 = dma.hbm_to_vmem [thread:$0]  %s104_s0, 256, %s15_s7, [#allocation3]  }
   0xc   :  { %82 = dma.done.wait [#allocation3], 256  }
   0xd   :  { %83 = vsyncadd [#allocation3], 4294967040  ;;  %s87_s11 = smov [#allocation5]   ;;  %v21_v0 = vld [vmem:[#allocation2] sm:$0xff]  ;;  %v22_v1 = vld [vmem:[#allocation2 + $0x8] sm:$0xff] }
   0xe   :  { %s31_s12 = sshll.u32 %s87_s11, 4  ;;  %23 = vst [vmem:[#allocation5] sm:$0xff] %v21_v0  ;;  %24 = vst [vmem:[#allocation5 + $0x8] sm:$0xff] %v22_v1  ;;  %s32_s12 = int_to_ptr.vmem [resolvable:$true] %s31_s12 }
   0xf   :  { %s62_s13 = scalar_lea.vmem %s32_s12, 256  ;;  %p67_p6 = scmp.lt.s32.totalorder %s32_s12, %s32_s12 }
  0x10   :  { %p63_p5 = scmp.ne.s32.totalorder %s32_s12, %s62_s13  ;;  %p68_p7 = scmp.lt.s32.totalorder %s62_s13, %s62_s13 }
  0x12   :  { %p69_p8 = por %p68_p7, %p67_p6 }
  0x14   :  { %p70_p9 = pnand %p69_p8, %p63_p5 }
  0x16   :  { %73 = shalt.err (!%p70_p9)
}
  0x17   :  { %34 = dma.vmem_to_hbm [thread:$0]  %s32_s12, 256, %s105_s1, [#allocation4]  }
  0x18   :  { %84 = dma.done.wait [#allocation4], 256  }
  0x19   :  { %85 = vsyncadd [#allocation4], 4294967040 }
  0x1a   :  { %38 = vsyncpa [#allocation3], 1 }
  0x1b   :  { %39 = vsyncpa [#allocation4], 1 }

</bundles_post_ra>
